<compile_context>
chip_gen: v7x
topology: tpu7x:2x2x1
jax: 0.10.0
libtpu: 0.0.40
codegen_flags: <defaults>
</compile_context>

<pallas_src>
import jax
import jax.numpy as jnp
from jax import lax
from jax.experimental import pallas as pl
from jax.experimental.pallas import tpu as pltpu


# ---------------------------------------------------------------------------
# in-kernel helpers (f32 elementwise math; EUP-friendly)
# ---------------------------------------------------------------------------
def _softmax_last(x):
    """Softmax over the last axis; denominator via EUP approx reciprocal +
    one Newton refinement (keeps ~f32 accuracy, avoids the divide path)."""
    m = jnp.max(x, axis=-1, keepdims=True)
    e = jnp.exp(x - m)
    s = jnp.sum(e, axis=-1, keepdims=True)
    r = pl.reciprocal(s, approx=True)
    r = r * (2.0 - s * r)            # Newton step: error ~ O(eps^2)
    return e * r


def _l2norm_last(x):
    """Matches F.normalize(x, p=2, dim=-1, eps=1e-12): x / max(||x||, 1e-12)."""
    ss = jnp.sum(x * x, axis=-1, keepdims=True)
    return x * lax.rsqrt(jnp.maximum(ss, 1e-24))


# ---------------------------------------------------------------------------
# kernel: grid = (batch blocks, candidate tiles)
# ---------------------------------------------------------------------------
def poly_head_kernel(ctx_ref, ctx_bias_ref, cand_ref, cand_bias_ref,
                     poly_ref, emb0_ref, wc_ref, bc_ref, wd_ref, bd_ref,
                     out_ref, ctxn_ref):
    f32 = jnp.float32
    Bt, S, H = ctx_ref.shape
    _, Rt, _, _ = cand_ref.shape
    M = poly_ref.shape[0]
    V = wc_ref.shape[1]
    G = Bt * Rt
    r = pl.program_id(1)

    # ---- context side: poly-code attention + context_fc + L2 norm.
    # Recomputed only when a new batch block starts (r == 0); reused from the
    # VMEM scratch for every candidate tile of the same batch block, so the
    # poly broadcast / ctx einsums are hoisted out of the inner R loop.
    @pl.when(r == 0)
    def _():
        ctx = ctx_ref[...]                                          # (Bt, S, H)
        cdt = ctx.dtype
        poly_b = jnp.broadcast_to(poly_ref[...][None], (Bt, M, H))
        s_ctx = jnp.einsum('bmh,bsh->bms', poly_b, ctx,
                           preferred_element_type=f32)              # (Bt, M, S)  MXU
        a_ctx = _softmax_last(s_ctx + ctx_bias_ref[...])            # bias (Bt, 1, S) f32
        ctx_vec = jnp.einsum('bms,bsh->bmh', a_ctx.astype(cdt), ctx,
                             preferred_element_type=f32)            # (Bt, M, H)  MXU
        ctx_p = jnp.dot(ctx_vec.reshape(Bt * M, H).astype(cdt), wc_ref[...],
                        preferred_element_type=f32) + bc_ref[...]   # flat (Bt*M, V) matmul
        ctxn_ref[...] = _l2norm_last(ctx_p).reshape(Bt, M, V)

    # ---- candidate side for the current Rt tile: q = poly code 0.
    # Degenerate q=1 attention stays off the MXU: VPU multiply + lane reduce
    # (over H) for the scores, VPU multiply + sublane reduce (over S) for the
    # weighted sum; both accumulate in f32.
    cand = cand_ref[...].reshape(G, S, H)                           # (G, S, H) compute dtype
    cdt = cand.dtype
    e0 = emb0_ref[...]                                              # (1, H)
    s_cnd = jnp.sum((cand * e0).astype(f32), axis=-1)               # (G, S)
    a_cnd = _softmax_last(s_cnd + cand_bias_ref[...].reshape(G, S))
    cand_vec = jnp.sum(a_cnd[:, :, None] * cand.astype(f32), axis=1)  # (G, H) f32

    cand_p = jnp.dot(cand_vec.astype(cdt), wd_ref[...],
                     preferred_element_type=f32) + bd_ref[...]      # flat (G, V) matmul
    cand_n = _l2norm_last(cand_p).reshape(Bt, Rt, V)

    # ---- final cross-attention, batched over Bt with Rt LHS rows (MXU).
    ctx_n = ctxn_ref[...]                                           # (Bt, M, V) f32
    fw = _softmax_last(jnp.einsum('brv,bmv->brm', cand_n, ctx_n,
                                  preferred_element_type=f32))      # (Bt, Rt, M)
    final = _l2norm_last(jnp.einsum('brm,bmv->brv', fw, ctx_n,
                                    preferred_element_type=f32))    # (Bt, Rt, V)

    dot = jnp.sum(final * cand_n, axis=-1)                          # (Bt, Rt)
    out_ref[...] = ((dot + 1.0) * 0.5).reshape(1, Bt, Rt)


# ---------------------------------------------------------------------------
# wrapper
# ---------------------------------------------------------------------------
def poly_encoder_forward(ctx_states, ctx_mask, cand_states, cand_mask, params,
                         *, compute_dtype=jnp.bfloat16):
    """cos_similarity = PolyEncoderModelShared.forward(..., labels=None,
    get_embedding=False), taking the encoder hidden states as inputs."""
    f32 = jnp.float32
    B, S, H = ctx_states.shape
    _, R, _, _ = cand_states.shape
    M = params["poly"].shape[0]
    V = params["wc"].shape[1]

    # Additive mask biases: score += (mask - 1) * 1e5
    ctx_bias = ((ctx_mask.astype(f32) - 1.0) * 100000.0).reshape(B, 1, S)
    cand_bias = ((cand_mask.astype(f32) - 1.0) * 100000.0).reshape(B, R, 1, S)

    # MXU/VPU streamed operands optionally in bf16 (halves DMA traffic);
    # biases and all softmax/l2norm math stay f32 (v5e-safe).
    ctx_states = ctx_states.astype(compute_dtype)
    cand_states = cand_states.astype(compute_dtype)
    poly = params["poly"].astype(compute_dtype)
    emb0 = params["emb0"].astype(compute_dtype)
    wc = params["wc"].astype(compute_dtype)
    wd = params["wd"].astype(compute_dtype)
    bc = params["bc"].astype(f32).reshape(1, V)
    bd = params["bd"].astype(f32).reshape(1, V)

    # ---- generation-aware tile selection -----------------------------------
    isize = jnp.dtype(compute_dtype).itemsize
    if B <= 8:
        Bt = B                        # single batch block (block dim == full dim: legal)
    else:
        Bt = 8                        # multiple of 8: legal sublane blocking; >=2 parallel steps
    B_pad = -(-B // Bt) * Bt

    try:
        vmem_cap = int(pltpu.get_tpu_info().vmem_capacity_bytes)   # 128 MiB v5e/v6e, 64 MiB v7x
    except Exception:
        vmem_cap = 128 * 1024 * 1024

    # Per candidate row of the tile: 2 pipelined compute-dtype buffers plus
    # ~3 f32-sized intermediates from the VPU attention path (+ the bias tile).
    per_r = Bt * S * H * (2 * isize + 3 * 4) + 2 * Bt * S * 4
    fixed = (2 * Bt * S * H * isize + 2 * Bt * S * 4        # ctx states + bias (double-buffered)
             + 2 * 2 * H * V * isize + 2 * (M + 1) * H * isize  # FC weights + poly codes
             + Bt * M * V * 4                                # ctx_n scratch
             + 4 * Bt * max(M, 8) * max(S, V) * 4            # small context-side temps
             + (2 << 20))                                    # slack
    budget = int(vmem_cap * 0.6)
    Rt = int(max(1, min(R, (budget - fixed) // per_r)))
    n_r = -(-R // Rt)
    R_pad = n_r * Rt

    if B_pad != B or R_pad != R:
        pb, pr = B_pad - B, R_pad - R
        ctx_states = jnp.pad(ctx_states, ((0, pb), (0, 0), (0, 0)))
        ctx_bias = jnp.pad(ctx_bias, ((0, pb), (0, 0), (0, 0)))
        cand_states = jnp.pad(cand_states, ((0, pb), (0, pr), (0, 0), (0, 0)))
        cand_bias = jnp.pad(cand_bias, ((0, pb), (0, pr), (0, 0), (0, 0)))

    n_b = B_pad // Bt
    grid = (n_b, n_r)
    need = fixed + Rt * per_r
    vmem_limit = int(min(vmem_cap * 0.9, max(need, 32 * 1024 * 1024)))

    out = pl.pallas_call(
        poly_head_kernel,
        out_shape=jax.ShapeDtypeStruct((n_r, B_pad, Rt), jnp.float32),
        grid_spec=pltpu.PrefetchScalarGridSpec(
            num_scalar_prefetch=0,
            grid=grid,
            in_specs=[
                pl.BlockSpec((Bt, S, H), lambda b, r: (b, 0, 0)),        # ctx states (not re-DMAed over r)
                pl.BlockSpec((Bt, 1, S), lambda b, r: (b, 0, 0)),        # ctx additive bias
                pl.BlockSpec((Bt, Rt, S, H), lambda b, r: (b, r, 0, 0)), # cand states (dominant stream)
                pl.BlockSpec((Bt, Rt, 1, S), lambda b, r: (b, r, 0, 0)), # cand additive bias
                pl.BlockSpec((M, H), lambda b, r: (0, 0)),               # poly codes 1..M
                pl.BlockSpec((1, H), lambda b, r: (0, 0)),               # poly code 0
                pl.BlockSpec((H, V), lambda b, r: (0, 0)),               # context_fc W^T
                pl.BlockSpec((1, V), lambda b, r: (0, 0)),               # context_fc b
                pl.BlockSpec((H, V), lambda b, r: (0, 0)),               # candidate_fc W^T
                pl.BlockSpec((1, V), lambda b, r: (0, 0)),               # candidate_fc b
            ],
            out_specs=pl.BlockSpec((1, Bt, Rt), lambda b, r: (r, b, 0)),
            scratch_shapes=[pltpu.VMEM((Bt, M, V), jnp.float32)],        # ctx_n cache across r
        ),
        compiler_params=pltpu.CompilerParams(
            dimension_semantics=("parallel", "arbitrary"),
            vmem_limit_bytes=vmem_limit),
    )(ctx_states, ctx_bias, cand_states, cand_bias, poly, emb0, wc, bc, wd, bd)

    out = jnp.transpose(out, (1, 0, 2)).reshape(B_pad, R_pad)
    return out[:B, :R]


# ---------------------------------------------------------------------------
# pure-JAX reference (mirror of the PyTorch forward, labels=None branch)
# ---------------------------------------------------------------------------
def _l2norm_ref(x):
    n = jnp.sqrt(jnp.sum(x * x, axis=-1, keepdims=True))
    return x / jnp.maximum(n, 1e-12)


def reference_forward(ctx_states, ctx_mask, cand_states, cand_mask, params):
    def dot_attention(q, k, v, v_mask=None):
        w = jnp.einsum('...qd,...kd->...qk', q, k)
        if v_mask is not None:
            w = w + (1.0 - v_mask[..., None, :]) * (-100000.0)
        w = jax.nn.softmax(w, axis=-1)
        return jnp.einsum('...qk,...kd->...qd', w, v)

    B, S, H = ctx_states.shape
    _, R, _, _ = cand_states.shape
    poly = jnp.broadcast_to(params["poly"][None], (B,) + params["poly"].shape)
    ctx_vecs = dot_attention(poly, ctx_states, ctx_states,
                             ctx_mask.astype(jnp.float32))                 # (B, M, H)

    cand_flat = cand_states.reshape(B * R, S, H)
    cmask_flat = cand_mask.reshape(B * R, S).astype(jnp.float32)
    q0 = jnp.broadcast_to(params["emb0"][None], (B * R, 1, H))
    cand_vec = dot_attention(q0, cand_flat, cand_flat, cmask_flat)
    cand_vec = cand_vec.reshape(B, R, H)

    ctx_vecs = _l2norm_ref(ctx_vecs @ params["wc"] + params["bc"])
    cand_vec = _l2norm_ref(cand_vec @ params["wd"] + params["bd"])

    final = dot_attention(cand_vec, ctx_vecs, ctx_vecs, None)
    final = _l2norm_ref(final)
    dot = jnp.sum(final * cand_vec, -1)
    return (dot + 1.0) / 2.0


if __name__ == "__main__":
    B, R, S, H = 2, 3, 8, 32        # batch, res_cnt, seq_length, hidden_size
    M, V = 4, 64                    # poly_m, vec_dim (vec_dim fixed to 64 in the module)

    key = jax.random.PRNGKey(0)
    ks = jax.random.split(key, 8)

    # Synthetic encoder outputs (stand-ins for the AutoModel hidden states).
    ctx_states = jax.random.normal(ks[0], (B, S, H), jnp.float32)
    cand_states = jax.random.normal(ks[1], (B, R, S, H), jnp.float32)

    # 0/1 attention masks with at least the first token valid.
    ctx_mask = (jax.random.uniform(ks[2], (B, S)) > 0.3).astype(jnp.float32)
    ctx_mask = ctx_mask.at[:, 0].set(1.0)
    cand_mask = (jax.random.uniform(ks[3], (B, R, S)) > 0.3).astype(jnp.float32)
    cand_mask = cand_mask.at[:, :, 0].set(1.0)

    # Deterministic parameters (poly_code_embeddings is (poly_m+1, H)).
    emb = 0.1 * jax.random.normal(ks[4], (M + 1, H), jnp.float32)
    params = {
        "poly": emb[1:M + 1],                                        # rows 1..M
        "emb0": emb[0:1],                                            # row 0
        "wc": 0.1 * jax.random.normal(ks[5], (H, V), jnp.float32),   # context_fc.weight.T
        "bc": 0.01 * jax.random.normal(ks[6], (1, V), jnp.float32),
        "wd": 0.1 * jax.random.normal(ks[7], (H, V), jnp.float32),   # candidate_fc.weight.T
        "bd": jnp.zeros((1, V), jnp.float32),
    }

    ref = reference_forward(ctx_states, ctx_mask, cand_states, cand_mask, params)

    # f32 path: tight check against the pure-JAX reference.
    cos_f32 = jax.block_until_ready(
        poly_encoder_forward(ctx_states, ctx_mask, cand_states, cand_mask, params,
                             compute_dtype=jnp.float32))
    assert cos_f32.shape == (B, R)
    assert bool(jnp.allclose(cos_f32, ref, atol=3e-3, rtol=3e-3)), (cos_f32, ref)

    # Default bf16 input/weight path (half the HBM traffic); loose sanity check.
    cos_bf16 = jax.block_until_ready(
        poly_encoder_forward(ctx_states, ctx_mask, cand_states, cand_mask, params))
    assert cos_bf16.shape == (B, R)
    assert bool(jnp.all(jnp.isfinite(cos_bf16)))
    assert bool(jnp.max(jnp.abs(cos_bf16 - ref)) < 0.1), (cos_bf16, ref)

    print("KERNEL_OK")
</pallas_src>

<mosaic_0001>
module attributes {stable_mosaic.version = 11 : i64} {
  func.func @poly_head_kernel(%arg0: i32, %arg1: i32, %arg2: memref<2x8x32xf32, #tpu.memory_space<vmem>>, %arg3: memref<2x1x8xf32, #tpu.memory_space<vmem>>, %arg4: memref<2x3x8x32xf32, #tpu.memory_space<vmem>>, %arg5: memref<2x3x1x8xf32, #tpu.memory_space<vmem>>, %arg6: memref<4x32xf32, #tpu.memory_space<vmem>>, %arg7: memref<1x32xf32, #tpu.memory_space<vmem>>, %arg8: memref<32x64xf32, #tpu.memory_space<vmem>>, %arg9: memref<1x64xf32, #tpu.memory_space<vmem>>, %arg10: memref<32x64xf32, #tpu.memory_space<vmem>>, %arg11: memref<1x64xf32, #tpu.memory_space<vmem>>, %arg12: memref<1x2x3xf32, #tpu.memory_space<vmem>>, %arg13: memref<2x4x64xf32, #tpu.memory_space<vmem>>) attributes {dimension_semantics = [#tpu.dimension_semantics<parallel>, #tpu.dimension_semantics<arbitrary>], iteration_bounds = array<i64: 1, 1>, scalar_prefetch = 0 : i64, scratch_operands = 1 : i64, tpu.core_type = #tpu.core_type<tc>, window_params = [{transform_indices = @transform_0, window_bounds = array<i64: 2, 8, 32>}, {transform_indices = @transform_1, window_bounds = array<i64: 2, 1, 8>}, {transform_indices = @transform_2, window_bounds = array<i64: 2, 3, 8, 32>}, {transform_indices = @transform_3, window_bounds = array<i64: 2, 3, 1, 8>}, {pipeline_mode = #tpu.pipeline_mode<synchronous>, transform_indices = @transform_4, window_bounds = array<i64: 4, 32>}, {pipeline_mode = #tpu.pipeline_mode<synchronous>, transform_indices = @transform_5, window_bounds = array<i64: 1, 32>}, {pipeline_mode = #tpu.pipeline_mode<synchronous>, transform_indices = @transform_6, window_bounds = array<i64: 32, 64>}, {pipeline_mode = #tpu.pipeline_mode<synchronous>, transform_indices = @transform_7, window_bounds = array<i64: 1, 64>}, {pipeline_mode = #tpu.pipeline_mode<synchronous>, transform_indices = @transform_8, window_bounds = array<i64: 32, 64>}, {pipeline_mode = #tpu.pipeline_mode<synchronous>, transform_indices = @transform_9, window_bounds = array<i64: 1, 64>}, {transform_indices = @transform_10, window_bounds = array<i64: 1, 2, 3>}]} {
    %c0_i32 = arith.constant 0 : i32
    %0 = arith.cmpi eq, %arg1, %c0_i32 : i32
    %1 = arith.extui %0 : i1 to i32
    %c0_i32_0 = arith.constant 0 : i32
    %2 = arith.cmpi ne, %1, %c0_i32_0 : i32
    scf.if %2 {
      %c0_37 = arith.constant 0 : index
      %c0_38 = arith.constant 0 : index
      %c0_39 = arith.constant 0 : index
      %78 = vector.load %arg2[%c0_37, %c0_38, %c0_39] : memref<2x8x32xf32, #tpu.memory_space<vmem>>, vector<2x8x32xf32>
      %c0_40 = arith.constant 0 : index
      %c0_41 = arith.constant 0 : index
      %79 = vector.load %arg6[%c0_40, %c0_41] : memref<4x32xf32, #tpu.memory_space<vmem>>, vector<4x32xf32>
      %80 = vector.shape_cast %79 : vector<4x32xf32> to vector<1x4x32xf32>
      %81 = vector.shape_cast %80 : vector<1x4x32xf32> to vector<1x4x32xf32>
      %82 = vector.broadcast %81 : vector<1x4x32xf32> to vector<2x4x32xf32>
      "tpu.trace_start"() <{level = 10 : i32, message = "bmh,bsh->bms"}> : () -> ()
      %cst_42 = arith.constant dense<0.000000e+00> : vector<2x4x8xf32>
      %83 = tpu.matmul %82, %78, %cst_42 {dimension_numbers = #tpu.dot_dimension_numbers<[2], [2], [1], [1], [0, 0, 0, 1, 1, 1], [0], [0]>} : vector<2x4x32xf32>, vector<2x8x32xf32>, vector<2x4x8xf32> -> vector<2x4x8xf32>
      "tpu.trace_stop"() : () -> ()
      %c0_43 = arith.constant 0 : index
      %c0_44 = arith.constant 0 : index
      %c0_45 = arith.constant 0 : index
      %84 = vector.load %arg3[%c0_43, %c0_44, %c0_45] : memref<2x1x8xf32, #tpu.memory_space<vmem>>, vector<2x1x8xf32>
      %85 = vector.broadcast %84 : vector<2x1x8xf32> to vector<2x4x8xf32>
      %86 = arith.addf %83, %85 : vector<2x4x8xf32>
      %cst_46 = arith.constant dense<0xFF800000> : vector<2x4xf32>
      %87 = vector.multi_reduction <maximumf>, %86, %cst_46 [2] : vector<2x4x8xf32> to vector<2x4xf32>
      %88 = vector.shape_cast %87 : vector<2x4xf32> to vector<2x4x1xf32>
      %89 = vector.broadcast %88 : vector<2x4x1xf32> to vector<2x4x8xf32>
      %90 = arith.subf %86, %89 : vector<2x4x8xf32>
      %91 = math.exp %90 : vector<2x4x8xf32>
      %cst_47 = arith.constant dense<0.000000e+00> : vector<2x4xf32>
      %92 = vector.multi_reduction <add>, %91, %cst_47 [2] : vector<2x4x8xf32> to vector<2x4xf32>
      %93 = vector.shape_cast %92 : vector<2x4xf32> to vector<2x4x1xf32>
      %94 = tpu.reciprocal %93 {approx = true} : vector<2x4x1xf32> -> vector<2x4x1xf32>
      %95 = arith.mulf %93, %94 : vector<2x4x1xf32>
      %cst_48 = arith.constant 2.000000e+00 : f32
      %96 = vector.broadcast %cst_48 : f32 to vector<2x4x1xf32>
      %97 = arith.subf %96, %95 : vector<2x4x1xf32>
      %98 = arith.mulf %94, %97 : vector<2x4x1xf32>
      %99 = vector.broadcast %98 : vector<2x4x1xf32> to vector<2x4x8xf32>
      %100 = arith.mulf %91, %99 : vector<2x4x8xf32>
      "tpu.trace_start"() <{level = 10 : i32, message = "bms,bsh->bmh"}> : () -> ()
      %cst_49 = arith.constant dense<0.000000e+00> : vector<2x4x32xf32>
      %101 = tpu.matmul %100, %78, %cst_49 {dimension_numbers = #tpu.dot_dimension_numbers<[2], [1], [1], [2], [0, 0, 0, 1, 1, 2], [0], [0]>} : vector<2x4x8xf32>, vector<2x8x32xf32>, vector<2x4x32xf32> -> vector<2x4x32xf32>
      "tpu.trace_stop"() : () -> ()
      %102 = vector.shape_cast %101 : vector<2x4x32xf32> to vector<8x32xf32>
      %c0_50 = arith.constant 0 : index
      %c0_51 = arith.constant 0 : index
      %103 = vector.load %arg8[%c0_50, %c0_51] : memref<32x64xf32, #tpu.memory_space<vmem>>, vector<32x64xf32>
      %cst_52 = arith.constant dense<0.000000e+00> : vector<8x64xf32>
      %104 = tpu.matmul %102, %103, %cst_52 {dimension_numbers = #tpu.dot_dimension_numbers<[1], [0], [0], [1], [0, 0, 1, 1], [], []>} : vector<8x32xf32>, vector<32x64xf32>, vector<8x64xf32> -> vector<8x64xf32>
      %c0_53 = arith.constant 0 : index
      %c0_54 = arith.constant 0 : index
      %105 = vector.load %arg9[%c0_53, %c0_54] : memref<1x64xf32, #tpu.memory_space<vmem>>, vector<1x64xf32>
      %106 = vector.broadcast %105 : vector<1x64xf32> to vector<8x64xf32>
      %107 = arith.addf %104, %106 : vector<8x64xf32>
      %108 = arith.mulf %107, %107 : vector<8x64xf32>
      %cst_55 = arith.constant dense<0.000000e+00> : vector<8xf32>
      %109 = vector.multi_reduction <add>, %108, %cst_55 [1] : vector<8x64xf32> to vector<8xf32>
      %110 = vector.shape_cast %109 : vector<8xf32> to vector<8x1xf32>
      %cst_56 = arith.constant 1.000000e-24 : f32
      %111 = vector.broadcast %cst_56 : f32 to vector<8x1xf32>
      %112 = arith.maximumf %110, %111 : vector<8x1xf32>
      %113 = math.rsqrt %112 : vector<8x1xf32>
      %114 = vector.broadcast %113 : vector<8x1xf32> to vector<8x64xf32>
      %115 = arith.mulf %107, %114 : vector<8x64xf32>
      %116 = vector.shape_cast %115 : vector<8x64xf32> to vector<2x4x64xf32>
      %c0_57 = arith.constant 0 : index
      %c0_58 = arith.constant 0 : index
      %c0_59 = arith.constant 0 : index
      %117 = vector.load %arg13[%c0_57, %c0_58, %c0_59] : memref<2x4x64xf32, #tpu.memory_space<vmem>>, vector<2x4x64xf32>
      tpu.vector_store %arg13[%c0_57, %c0_58, %c0_59], %116 {strides = array<i32>} : memref<2x4x64xf32, #tpu.memory_space<vmem>>, vector<2x4x64xf32>,
    } else {
    }
    %c0 = arith.constant 0 : index
    %c0_1 = arith.constant 0 : index
    %c0_2 = arith.constant 0 : index
    %c0_3 = arith.constant 0 : index
    %3 = vector.load %arg4[%c0, %c0_1, %c0_2, %c0_3] : memref<2x3x8x32xf32, #tpu.memory_space<vmem>>, vector<2x3x8x32xf32>
    %4 = vector.shape_cast %3 : vector<2x3x8x32xf32> to vector<6x8x32xf32>
    %c0_4 = arith.constant 0 : index
    %c0_5 = arith.constant 0 : index
    %5 = vector.load %arg7[%c0_4, %c0_5] : memref<1x32xf32, #tpu.memory_space<vmem>>, vector<1x32xf32>
    %6 = vector.shape_cast %5 : vector<1x32xf32> to vector<1x1x32xf32>
    %7 = vector.broadcast %6 : vector<1x1x32xf32> to vector<6x8x32xf32>
    %8 = arith.mulf %4, %7 : vector<6x8x32xf32>
    %cst = arith.constant dense<0.000000e+00> : vector<6x8xf32>
    %9 = vector.multi_reduction <add>, %8, %cst [2] : vector<6x8x32xf32> to vector<6x8xf32>
    %c0_6 = arith.constant 0 : index
    %c0_7 = arith.constant 0 : index
    %c0_8 = arith.constant 0 : index
    %c0_9 = arith.constant 0 : index
    %10 = vector.load %arg5[%c0_6, %c0_7, %c0_8, %c0_9] : memref<2x3x1x8xf32, #tpu.memory_space<vmem>>, vector<2x3x1x8xf32>
    %11 = vector.shape_cast %10 : vector<2x3x1x8xf32> to vector<6x8xf32>
    %12 = arith.addf %9, %11 : vector<6x8xf32>
    %cst_10 = arith.constant dense<0xFF800000> : vector<6xf32>
    %13 = vector.multi_reduction <maximumf>, %12, %cst_10 [1] : vector<6x8xf32> to vector<6xf32>
    %14 = vector.shape_cast %13 : vector<6xf32> to vector<6x1xf32>
    %15 = vector.broadcast %14 : vector<6x1xf32> to vector<6x8xf32>
    %16 = arith.subf %12, %15 : vector<6x8xf32>
    %17 = math.exp %16 : vector<6x8xf32>
    %cst_11 = arith.constant dense<0.000000e+00> : vector<6xf32>
    %18 = vector.multi_reduction <add>, %17, %cst_11 [1] : vector<6x8xf32> to vector<6xf32>
    %19 = vector.shape_cast %18 : vector<6xf32> to vector<6x1xf32>
    %20 = tpu.reciprocal %19 {approx = true} : vector<6x1xf32> -> vector<6x1xf32>
    %21 = arith.mulf %19, %20 : vector<6x1xf32>
    %cst_12 = arith.constant 2.000000e+00 : f32
    %22 = vector.broadcast %cst_12 : f32 to vector<6x1xf32>
    %23 = arith.subf %22, %21 : vector<6x1xf32>
    %24 = arith.mulf %20, %23 : vector<6x1xf32>
    %25 = vector.broadcast %24 : vector<6x1xf32> to vector<6x8xf32>
    %26 = arith.mulf %17, %25 : vector<6x8xf32>
    %27 = vector.shape_cast %26 : vector<6x8xf32> to vector<6x8x1xf32>
    %28 = vector.broadcast %27 : vector<6x8x1xf32> to vector<6x8x32xf32>
    %29 = arith.mulf %28, %4 : vector<6x8x32xf32>
    %cst_13 = arith.constant dense<0.000000e+00> : vector<6x32xf32>
    %30 = vector.multi_reduction <add>, %29, %cst_13 [1] : vector<6x8x32xf32> to vector<6x32xf32>
    %c0_14 = arith.constant 0 : index
    %c0_15 = arith.constant 0 : index
    %31 = vector.load %arg10[%c0_14, %c0_15] : memref<32x64xf32, #tpu.memory_space<vmem>>, vector<32x64xf32>
    %cst_16 = arith.constant dense<0.000000e+00> : vector<6x64xf32>
    %32 = tpu.matmul %30, %31, %cst_16 {dimension_numbers = #tpu.dot_dimension_numbers<[1], [0], [0], [1], [0, 0, 1, 1], [], []>} : vector<6x32xf32>, vector<32x64xf32>, vector<6x64xf32> -> vector<6x64xf32>
    %c0_17 = arith.constant 0 : index
    %c0_18 = arith.constant 0 : index
    %33 = vector.load %arg11[%c0_17, %c0_18] : memref<1x64xf32, #tpu.memory_space<vmem>>, vector<1x64xf32>
    %34 = vector.broadcast %33 : vector<1x64xf32> to vector<6x64xf32>
    %35 = arith.addf %32, %34 : vector<6x64xf32>
    %36 = arith.mulf %35, %35 : vector<6x64xf32>
    %cst_19 = arith.constant dense<0.000000e+00> : vector<6xf32>
    %37 = vector.multi_reduction <add>, %36, %cst_19 [1] : vector<6x64xf32> to vector<6xf32>
    %38 = vector.shape_cast %37 : vector<6xf32> to vector<6x1xf32>
    %cst_20 = arith.constant 1.000000e-24 : f32
    %39 = vector.broadcast %cst_20 : f32 to vector<6x1xf32>
    %40 = arith.maximumf %38, %39 : vector<6x1xf32>
    %41 = math.rsqrt %40 : vector<6x1xf32>
    %42 = vector.broadcast %41 : vector<6x1xf32> to vector<6x64xf32>
    %43 = arith.mulf %35, %42 : vector<6x64xf32>
    %44 = vector.shape_cast %43 : vector<6x64xf32> to vector<2x3x64xf32>
    %c0_21 = arith.constant 0 : index
    %c0_22 = arith.constant 0 : index
    %c0_23 = arith.constant 0 : index
    %45 = vector.load %arg13[%c0_21, %c0_22, %c0_23] : memref<2x4x64xf32, #tpu.memory_space<vmem>>, vector<2x4x64xf32>
    "tpu.trace_start"() <{level = 10 : i32, message = "brv,bmv->brm"}> : () -> ()
    %cst_24 = arith.constant dense<0.000000e+00> : vector<2x3x4xf32>
    %46 = tpu.matmul %44, %45, %cst_24 {dimension_numbers = #tpu.dot_dimension_numbers<[2], [2], [1], [1], [0, 0, 0, 1, 1, 1], [0], [0]>} : vector<2x3x64xf32>, vector<2x4x64xf32>, vector<2x3x4xf32> -> vector<2x3x4xf32>
    "tpu.trace_stop"() : () -> ()
    %cst_25 = arith.constant dense<0xFF800000> : vector<2x3xf32>
    %47 = vector.multi_reduction <maximumf>, %46, %cst_25 [2] : vector<2x3x4xf32> to vector<2x3xf32>
    %48 = vector.shape_cast %47 : vector<2x3xf32> to vector<2x3x1xf32>
    %49 = vector.broadcast %48 : vector<2x3x1xf32> to vector<2x3x4xf32>
    %50 = arith.subf %46, %49 : vector<2x3x4xf32>
    %51 = math.exp %50 : vector<2x3x4xf32>
    %cst_26 = arith.constant dense<0.000000e+00> : vector<2x3xf32>
    %52 = vector.multi_reduction <add>, %51, %cst_26 [2] : vector<2x3x4xf32> to vector<2x3xf32>
    %53 = vector.shape_cast %52 : vector<2x3xf32> to vector<2x3x1xf32>
    %54 = tpu.reciprocal %53 {approx = true} : vector<2x3x1xf32> -> vector<2x3x1xf32>
    %55 = arith.mulf %53, %54 : vector<2x3x1xf32>
    %cst_27 = arith.constant 2.000000e+00 : f32
    %56 = vector.broadcast %cst_27 : f32 to vector<2x3x1xf32>
    %57 = arith.subf %56, %55 : vector<2x3x1xf32>
    %58 = arith.mulf %54, %57 : vector<2x3x1xf32>
    %59 = vector.broadcast %58 : vector<2x3x1xf32> to vector<2x3x4xf32>
    %60 = arith.mulf %51, %59 : vector<2x3x4xf32>
    "tpu.trace_start"() <{level = 10 : i32, message = "brm,bmv->brv"}> : () -> ()
    %cst_28 = arith.constant dense<0.000000e+00> : vector<2x3x64xf32>
    %61 = tpu.matmul %60, %45, %cst_28 {dimension_numbers = #tpu.dot_dimension_numbers<[2], [1], [1], [2], [0, 0, 0, 1, 1, 2], [0], [0]>} : vector<2x3x4xf32>, vector<2x4x64xf32>, vector<2x3x64xf32> -> vector<2x3x64xf32>
    "tpu.trace_stop"() : () -> ()
    %62 = arith.mulf %61, %61 : vector<2x3x64xf32>
    %cst_29 = arith.constant dense<0.000000e+00> : vector<2x3xf32>
    %63 = vector.multi_reduction <add>, %62, %cst_29 [2] : vector<2x3x64xf32> to vector<2x3xf32>
    %64 = vector.shape_cast %63 : vector<2x3xf32> to vector<2x3x1xf32>
    %cst_30 = arith.constant 1.000000e-24 : f32
    %65 = vector.broadcast %cst_30 : f32 to vector<2x3x1xf32>
    %66 = arith.maximumf %64, %65 : vector<2x3x1xf32>
    %67 = math.rsqrt %66 : vector<2x3x1xf32>
    %68 = vector.broadcast %67 : vector<2x3x1xf32> to vector<2x3x64xf32>
    %69 = arith.mulf %61, %68 : vector<2x3x64xf32>
    %70 = arith.mulf %69, %44 : vector<2x3x64xf32>
    %cst_31 = arith.constant dense<0.000000e+00> : vector<2x3xf32>
    %71 = vector.multi_reduction <add>, %70, %cst_31 [2] : vector<2x3x64xf32> to vector<2x3xf32>
    %cst_32 = arith.constant 1.000000e+00 : f32
    %72 = vector.broadcast %cst_32 : f32 to vector<2x3xf32>
    %73 = arith.addf %71, %72 : vector<2x3xf32>
    %cst_33 = arith.constant 5.000000e-01 : f32
    %74 = vector.broadcast %cst_33 : f32 to vector<2x3xf32>
    %75 = arith.mulf %73, %74 : vector<2x3xf32>
    %76 = vector.shape_cast %75 : vector<2x3xf32> to vector<1x2x3xf32>
    %c0_34 = arith.constant 0 : index
    %c0_35 = arith.constant 0 : index
    %c0_36 = arith.constant 0 : index
    %77 = vector.load %arg12[%c0_34, %c0_35, %c0_36] : memref<1x2x3xf32, #tpu.memory_space<vmem>>, vector<1x2x3xf32>
    tpu.vector_store %arg12[%c0_34, %c0_35, %c0_36], %76 {strides = array<i32>} : memref<1x2x3xf32, #tpu.memory_space<vmem>>, vector<1x2x3xf32>,
    return
  }
  func.func @transform_0(%arg0: i32, %arg1: i32) -> (i32, i32, i32) {
    %c0_i32 = arith.constant 0 : i32
    %c0_i32_0 = arith.constant 0 : i32
    %c0_i32_1 = arith.constant 0 : i32
    return %arg0, %c0_i32, %c0_i32_0 : i32, i32, i32
  }
  func.func @transform_1(%arg0: i32, %arg1: i32) -> (i32, i32, i32) {
    %c0_i32 = arith.constant 0 : i32
    %c0_i32_0 = arith.constant 0 : i32
    %c0_i32_1 = arith.constant 0 : i32
    return %arg0, %c0_i32, %c0_i32_0 : i32, i32, i32
  }
  func.func @transform_2(%arg0: i32, %arg1: i32) -> (i32, i32, i32, i32) {
    %c0_i32 = arith.constant 0 : i32
    %c0_i32_0 = arith.constant 0 : i32
    %c0_i32_1 = arith.constant 0 : i32
    return %arg0, %arg1, %c0_i32, %c0_i32_0 : i32, i32, i32, i32
  }
  func.func @transform_3(%arg0: i32, %arg1: i32) -> (i32, i32, i32, i32) {
    %c0_i32 = arith.constant 0 : i32
    %c0_i32_0 = arith.constant 0 : i32
    %c0_i32_1 = arith.constant 0 : i32
    return %arg0, %arg1, %c0_i32, %c0_i32_0 : i32, i32, i32, i32
  }
  func.func @transform_4(%arg0: i32, %arg1: i32) -> (i32, i32) {
    %c0_i32 = arith.constant 0 : i32
    %c0_i32_0 = arith.constant 0 : i32
    %c0_i32_1 = arith.constant 0 : i32
    return %c0_i32, %c0_i32_0 : i32, i32
  }
  func.func @transform_5(%arg0: i32, %arg1: i32) -> (i32, i32) {
    %c0_i32 = arith.constant 0 : i32
    %c0_i32_0 = arith.constant 0 : i32
    %c0_i32_1 = arith.constant 0 : i32
    return %c0_i32, %c0_i32_0 : i32, i32
  }
  func.func @transform_6(%arg0: i32, %arg1: i32) -> (i32, i32) {
    %c0_i32 = arith.constant 0 : i32
    %c0_i32_0 = arith.constant 0 : i32
    %c0_i32_1 = arith.constant 0 : i32
    return %c0_i32, %c0_i32_0 : i32, i32
  }
  func.func @transform_7(%arg0: i32, %arg1: i32) -> (i32, i32) {
    %c0_i32 = arith.constant 0 : i32
    %c0_i32_0 = arith.constant 0 : i32
    %c0_i32_1 = arith.constant 0 : i32
    return %c0_i32, %c0_i32_0 : i32, i32
  }
  func.func @transform_8(%arg0: i32, %arg1: i32) -> (i32, i32) {
    %c0_i32 = arith.constant 0 : i32
    %c0_i32_0 = arith.constant 0 : i32
    %c0_i32_1 = arith.constant 0 : i32
    return %c0_i32, %c0_i32_0 : i32, i32
  }
  func.func @transform_9(%arg0: i32, %arg1: i32) -> (i32, i32) {
    %c0_i32 = arith.constant 0 : i32
    %c0_i32_0 = arith.constant 0 : i32
    %c0_i32_1 = arith.constant 0 : i32
    return %c0_i32, %c0_i32_0 : i32, i32
  }
  func.func @transform_10(%arg0: i32, %arg1: i32) -> (i32, i32, i32) {
    %c0_i32 = arith.constant 0 : i32
    %c0_i32_0 = arith.constant 0 : i32
    return %arg1, %arg0, %c0_i32 : i32, i32, i32
  }
}

</mosaic_0001>

<bundles_post_ra>
// kernel: tpu_custom_call.1
= control target key start
LH: loop header
LB: loop body
LE: loop exit
PB: predicated region body
PF: predicated region fallthrough
CT: control target
= control target key end

     0   :  { %15 = vsyncpa [#allocation4], 0  ;;  %s2264_s0 = inlined_call_operand.hbm [shape: f32[2,8,32], index: 0, kind: input, shape index: {}]   ;;  %s2265_s1 = inlined_call_operand.hbm [shape: f32[2,1,8], index: 1, kind: input, shape index: {}]   ;;  %s2266_s2 = inlined_call_operand.hbm [shape: f32[2,3,8,32], index: 2, kind: input, shape index: {}]   ;;  %s2267_s3 = inlined_call_operand.vmem [shape: f32[2,3,1,8], index: 3, kind: input, shape index: {}]   ;;  %s2268_s4 = inlined_call_operand.vmem [shape: f32[4,32], index: 4, kind: input, shape index: {}]   ;;  %s2269_s5 = inlined_call_operand.vmem [shape: f32[1,32], index: 5, kind: input, shape index: {}]   ;;  %s2270_s6 = inlined_call_operand.hbm [shape: f32[32,64], index: 6, kind: input, shape index: {}]   ;;  %s2271_s7 = inlined_call_operand.vmem [shape: f32[1,64], index: 7, kind: input, shape index: {}]   ;;  %s2272_s8 = inlined_call_operand.hbm [shape: f32[32,64], index: 8, kind: input, shape index: {}]   ;;  %s2273_s9 = inlined_call_operand.vmem [shape: f32[1,64], index: 9, kind: input, shape index: {}]   ;;  %s2274_s10 = inlined_call_operand.hbm [shape: f32[1,2,3], index: 10, kind: output, shape index: {}]  }
   0x1   :  { %16 = vsyncpa [#allocation7], 0 }
   0x2   :  { %17 = vsyncpa [#allocation10], 0 }
   0x3   :  { %18 = vsyncpa [#allocation5], 0  ;;  %s1857_s13 = smov [#allocation6]   ;;  %s1717_s17 = scalar_lea.hbm %s2265_s1, 32 }
   0x4   :  { %s36_s14 = sshll.u32 %s1857_s13, 4  ;;  %p1718_p0 = scmp.ne.s32.totalorder %s2265_s1, %s1717_s17  ;;  %s37_s14 = int_to_ptr.vmem [resolvable:$true] %s36_s14 }
   0x5   :  { %p1721_p1 = scmp.lt.u32.totalorder %s1717_s17, %s2265_s1 }
   0x7   :  { %p1723_p2 = pnand %p1721_p1, %p1718_p0 }
   0x9   :  { %1726 = shalt.err (!%p1723_p2)
}
   0xa   :  { %s1727_s22 = scalar_lea.vmem %s37_s14, 32  ;;  %p1732_p4 = scmp.lt.s32.totalorder %s37_s14, %s37_s14 }
   0xb   :  { %p1728_p3 = scmp.ne.s32.totalorder %s37_s14, %s1727_s22  ;;  %p1733_p5 = scmp.lt.s32.totalorder %s1727_s22, %s1727_s22 }
   0xd   :  { %p1734_p6 = por %p1733_p5, %p1732_p4 }
   0xf   :  { %p1735_p7 = pnand %p1734_p6, %p1728_p3 }
  0x11   :  { %1738 = shalt.err (!%p1735_p7)
}
  0x12   :  { %s1858_s23 = smov 16   ;;  %s1859_s24 = smov 1  }
  0x13   :  { %42 = dma.hbm_to_vmem [thread:$0]  %s2265_s1, 32, %s37_s14, [#allocation7], %s1858_s23, %s1858_s23, %s1859_s24  }
  0x14   :  { %s1860_s27 = smov [#allocation9]   ;;  %s1861_s29 = smov [#allocation3]  }
  0x15   :  { %s66_s28 = sshll.u32 %s1860_s27, 4  ;;  %s24_s30 = sshll.u32 %s1861_s29, 4  ;;  %s67_s28 = int_to_ptr.vmem [resolvable:$true] %s66_s28  ;;  %s25_s30 = int_to_ptr.vmem [resolvable:$true] %s24_s30 }
  0x16   :  { %s1739_s13 = scalar_lea.hbm %s2270_s6, 512 }
  0x17   :  { %p1740_p8 = scmp.ne.s32.totalorder %s2270_s6, %s1739_s13  ;;  %p1743_p9 = scmp.lt.u32.totalorder %s1739_s13, %s2270_s6 }
  0x19   :  { %p1745_p10 = pnand %p1743_p9, %p1740_p8 }
  0x1b   :  { %1748 = shalt.err (!%p1745_p10)
}
  0x1c   :  { %s1749_s1 = scalar_lea.vmem %s67_s28, 512  ;;  %p1754_p12 = scmp.lt.s32.totalorder %s67_s28, %s67_s28 }
  0x1d   :  { %p1750_p11 = scmp.ne.s32.totalorder %s67_s28, %s1749_s1  ;;  %p1755_p13 = scmp.lt.s32.totalorder %s1749_s1, %s1749_s1 }
  0x1f   :  { %p1756_p0 = por %p1755_p13, %p1754_p12 }
  0x21   :  { %p1757_p1 = pnand %p1756_p0, %p1750_p11 }
  0x23   :  { %1760 = shalt.err (!%p1757_p1)
}
  0x24   :  { %s1862_s14 = smov 128   ;;  %s1863_s19 = smov 8  }
  0x25   :  { %72 = dma.hbm_to_vmem [thread:$0]  %s2270_s6, 512, %s67_s28, [#allocation10], %s1862_s14, %s1862_s14, %s1863_s19  }
  0x26   :  { %s1761_s24 = scalar_lea.hbm %s2264_s0, 256 }
  0x27   :  { %p1762_p2 = scmp.ne.s32.totalorder %s2264_s0, %s1761_s24  ;;  %p1765_p3 = scmp.lt.u32.totalorder %s1761_s24, %s2264_s0 }
  0x29   :  { %p1767_p4 = pnand %p1765_p3, %p1762_p2 }
  0x2b   :  { %1770 = shalt.err (!%p1767_p4)
}
  0x2c   :  { %s1771_s11 = scalar_lea.vmem %s25_s30, 256  ;;  %p1776_p6 = scmp.lt.s32.totalorder %s25_s30, %s25_s30 }
  0x2d   :  { %p1772_p5 = scmp.ne.s32.totalorder %s25_s30, %s1771_s11  ;;  %p1777_p7 = scmp.lt.s32.totalorder %s1771_s11, %s1771_s11 }
  0x2f   :  { %p1778_p8 = por %p1777_p7, %p1776_p6 }
  0x31   :  { %p1779_p9 = pnand %p1778_p8, %p1772_p5 }
  0x33   :  { %1782 = shalt.err (!%p1779_p9)
}
  0x34   :  { %30 = dma.hbm_to_vmem [thread:$0]  %s2264_s0, 256, %s25_s30, [#allocation4], %s1862_s14, %s1862_s14, %s1863_s19  }
  0x35   :  { %s1864_s12 = smov [#allocation8]   ;;  %s1865_s15 = smov [#allocation11]  }
  0x36   :  { %s48_s13 = sshll.u32 %s1864_s12, 4  ;;  %s80_s16 = sshll.u32 %s1865_s15, 4  ;;  %s49_s13 = int_to_ptr.vmem [resolvable:$true] %s48_s13  ;;  %s81_s16 = int_to_ptr.vmem [resolvable:$true] %s80_s16 }
  0x37   :  { %s1783_s1 = scalar_lea.hbm %s2266_s2, 768 }
  0x38   :  { %p1784_p10 = scmp.ne.s32.totalorder %s2266_s2, %s1783_s1  ;;  %p1787_p11 = scmp.lt.u32.totalorder %s1783_s1, %s2266_s2 }
  0x3a   :  { %p1789_p12 = pnand %p1787_p11, %p1784_p10 }
  0x3c   :  { %1792 = shalt.err (!%p1789_p12)
}
  0x3d   :  { %s1793_s0 = scalar_lea.vmem %s49_s13, 768  ;;  %p1798_p0 = scmp.lt.s32.totalorder %s49_s13, %s49_s13 }
  0x3e   :  { %p1794_p13 = scmp.ne.s32.totalorder %s49_s13, %s1793_s0  ;;  %p1799_p1 = scmp.lt.s32.totalorder %s1793_s0, %s1793_s0 }
  0x40   :  { %p1800_p2 = por %p1799_p1, %p1798_p0 }
  0x42   :  { %p1801_p3 = pnand %p1800_p2, %p1794_p13 }
  0x44   :  { %1804 = shalt.err (!%p1801_p3)
}
  0x45   :  { %54 = dma.hbm_to_vmem [thread:$0]  %s2266_s2, 768, %s49_s13, [#allocation7], %s1862_s14, %s1862_s14, %s1863_s19  }
  0x46   :  { %s1805_s27 = scalar_lea.hbm %s2272_s8, 512 }
  0x47   :  { %p1806_p4 = scmp.ne.s32.totalorder %s2272_s8, %s1805_s27  ;;  %p1809_p5 = scmp.lt.u32.totalorder %s1805_s27, %s2272_s8 }
  0x49   :  { %p1811_p6 = pnand %p1809_p5, %p1806_p4 }
  0x4b   :  { %1814 = shalt.err (!%p1811_p6)
}
  0x4c   :  { %s1815_s12 = scalar_lea.vmem %s81_s16, 512  ;;  %p1820_p8 = scmp.lt.s32.totalorder %s81_s16, %s81_s16 }
  0x4d   :  { %p1816_p7 = scmp.ne.s32.totalorder %s81_s16, %s1815_s12  ;;  %p1821_p9 = scmp.lt.s32.totalorder %s1815_s12, %s1815_s12 }
  0x4f   :  { %p1822_p10 = por %p1821_p9, %p1820_p8 }
  0x51   :  { %p1823_p11 = pnand %p1822_p10, %p1816_p7 }
  0x53   :  { %1826 = shalt.err (!%p1823_p11)
}
  0x54   :  { %86 = dma.hbm_to_vmem [thread:$0]  %s2272_s8, 512, %s81_s16, [#allocation10], %s1862_s14, %s1862_s14, %s1863_s19  }
  0x55   :  { %1849 = dma.done.wait [#allocation4], 256  }
  0x56   :  { %1850 = vsyncadd [#allocation4], 4294967040 }
  0x57   :  { %1851 = dma.done.wait [#allocation7], 800  }
  0x58   :  { %1852 = vsyncadd [#allocation7], 4294966496 }
  0x59   :  { %1853 = dma.done.wait [#allocation10], 1024  }
  0x5a   :  { %1854 = vsyncadd [#allocation10], 4294966272  ;;  %v1866_v0 = vmov 0.0   ;;  %vm1867_vm0 = vmmov 0   ;;  %vm125_vm1 = vcmask 261120   ;;  %v108_v1 = vld [vmem:[#allocation3] sm:$0xff]  ;;  %v679_v58 = vlaneseq }
  0x5b   :  { %1588 = vmatprep.subr.mxu0 %v1866_v0  ;;  %1593 = vmatprep.subr.mxu1 %v1866_v0  ;;  %v109_v2 = vld [vmem:[#allocation3 + $0x8] sm:$0xff]  ;;  %v1545_v4 = vld [vmem:[%s2269_s5] ss:$0 sm:$0xff]  ;;  %v2021_v10 = vld [vmem:[#allocation8 + $0x8] sm:$0xff]  ;;  %v1868_v26 = vmov 0   ;;  %vm275_vm2 = vcmask 60416  }
  0x5c   :  { %1590 = vmatprep.mubr.msk.f32.mxu0 %vm1867_vm0, %v1866_v0  ;;  %1595 = vmatprep.mubr.msk.f32.mxu1 %vm1867_vm0, %v1866_v0  ;;  %v2005_v3 = vld [vmem:[#allocation8 + $0x10] sm:$0xff]  ;;  %v2012_v5 = vld [vmem:[#allocation8] sm:$0xff]  ;;  %v2019_v9 = vld [vmem:[#allocation8 + $0x18] sm:$0xff]  ;;  %v565_v12 = vmul.f32 %v1545_v4, %v2021_v10  ;;  %v680_v59 = vand.u32 127, %v679_v58  ;;  %v2083_v60 = vshrl.u32 %v679_v58, 7  ;;  %vm705_vm3 = vcmask 1041409  }
  0x5d   :  { %1589 = vmatpush3.xpose.msk.msra.mxu0 %vm125_vm1, %v108_v1  ;;  %1594 = vmatpush3.xpose.msk.msra.mxu1 %vm125_vm1, %v109_v2  ;;  %v110_v6 = vld [vmem:[%s2268_s4] sm:$0xf]  ;;  %v566_v7 = vmul.f32 %v1545_v4, %v2005_v3  ;;  %v564_v8 = vmul.f32 %v1545_v4, %v2012_v5  ;;  %v567_v11 = vmul.f32 %v1545_v4, %v2019_v9  ;;  %v1550_v28 = vld [vmem:[%s2267_s3 + $0x4] ss:$0 sm:$0xff]  ;;  %v1551_v29 = vld [vmem:[%s2267_s3 + $0x5] ss:$0 sm:$0xff] }
  0x5e   :  { %1598 = vmatprep.subr.mxu0 %v1866_v0  ;;  %1603 = vmatprep.subr.mxu1 %v1866_v0  ;;  %v2027_v13 = vld [vmem:[#allocation8 + $0x28] sm:$0xff]  ;;  %v2029_v14 = vld [vmem:[#allocation8 + $0x20] sm:$0xff]  ;;  %v574_v18 = vsel %vm125_vm1, %v565_v12, 0.0  ;;  %v1535_v48 = vld [vmem:[#allocation6] ss:$0 sm:$0xff]  ;;  %v2086_v62 = vsub.s32 %v680_v59, %v2083_v60  ;;  %vm707_vm4 = vcmask 1042434  }
  0x5f   :  { %v577_v15 = vsel %vm125_vm1, %v566_v7, 0.0  ;;  %v571_v16 = vsel %vm125_vm1, %v564_v8, 0.0  ;;  %v580_v17 = vsel %vm125_vm1, %v567_v11, 0.0  ;;  %v569_v19 = vmul.f32 %v1545_v4, %v2027_v13  ;;  %v1547_v23 = vld [vmem:[%s2267_s3 + $0x1] ss:$0 sm:$0xff]  ;;  %1678 = vset.pattern.permute.xlu1 %v1868_v26  ;;  %1677 = vset.pattern.permute.xlu0 %v1868_v26 }
  0x60   :  { %1591 = vmatmul.mubr.msk.f32.vlgmr.msra.gmra.mrb[0].mxu0 %vm125_vm1, %v110_v6  ;;  %1596 = vmatmul.mubr.msk.f32.vlgmr.msra.gmra.mrb[0].mxu1 %vm125_vm1, %v110_v6  ;;  %v568_v20 = vmul.f32 %v1545_v4, %v2029_v14  ;;  %v1548_v24 = vld [vmem:[%s2267_s3 + $0x2] ss:$0 sm:$0xff]  ;;  %v1546_v25 = vld [vmem:[%s2267_s3] ss:$0 sm:$0xff]  ;;  %v1549_v27 = vld [vmem:[%s2267_s3 + $0x3] ss:$0 sm:$0xff] }
  0x61   :  { %578 = vadd.xlane.f32.xlu1 %v577_v15  ;;  %572 = vadd.xlane.f32.xlu0 %v571_v16  ;;  %v586_v21 = vsel %vm125_vm1, %v569_v19, 0.0  ;;  %v1536_v49 = vld [vmem:[#allocation6 + $0x1] ss:$0 sm:$0xff]  ;;  %vm709_vm5 = vcmask 1043459   ;;  %vm711_vm6 = vcmask 1044484   ;;  %vm713_vm7 = vcmask 1045509  }
  0x62   :  { %1599 = vmatpush3.msra.mxu0 %v108_v1  ;;  %1600 = vmatprep.mubr.msk.f32.mxu0 %vm1867_vm0, %v1866_v0  ;;  %v583_v22 = vsel %vm125_vm1, %v568_v20, 0.0  ;;  %vm716_vm8 = vcmask 62464   ;;  %vm304_vm9 = vcmask 64512   ;;  %vm538_vm10 = vcmask 523264  }
  0x63   :  { %1604 = vmatpush3.msra.mxu1 %v109_v2  ;;  %1605 = vmatprep.mubr.msk.f32.mxu1 %vm1867_vm0, %v1866_v0  ;;  %vm548_vm11 = vcmask 519168   ;;  %vm1040_vm12 = vcmask 521216   ;;  %vm1327_vm13 = vcmask 1043456   ;;  %vm1294_vm14 = vcmask 26624  }
  0x64   :  { %vm1323_vm15 = vcmask 31744  }
  0x65   :  { %581 = vadd.xlane.f32.xlu1 %v580_v17  ;;  %575 = vadd.xlane.f32.xlu0 %v574_v18 }
  0x69   :  { %587 = vadd.xlane.f32.xlu1 %v586_v21  ;;  %584 = vadd.xlane.f32.xlu0 %v583_v22 }
  0x7a   :  { %629 = vbcast.lane.b32.xlu1 %v1547_v23, 256 }
  0x7e   :  { %632 = vbcast.lane.b32.xlu1 %v1548_v24, 256 }
  0x7f   :  { %626 = vbcast.lane.b32.xlu0 %v1546_v25, 256 }
  0x82   :  { %635 = vbcast.lane.b32.xlu1 %v1549_v27, 256 }
  0x83   :  { %638 = vbcast.lane.b32.xlu0 %v1550_v28, 256 }
  0x86   :  { %641 = vbcast.lane.b32.xlu1 %v1551_v29, 256 }
  0xee   :  { %v579_v30 = vpop.xlane.xlu1 %578  ;;  %v573_v31 = vpop.xlane.xlu0 %572 }
  0xf2   :  { %v582_v32 = vpop.xlane.xlu1 %581  ;;  %v576_v33 = vpop.xlane.xlu0 %575 }
  0xf6   :  { %v588_v34 = vpop.xlane.xlu1 %587  ;;  %v585_v35 = vpop.xlane.xlu0 %584 }
  0xfa   :  { %v630_v36 = vpop.permute.xlu1 %629  ;;  %v627_v37 = vpop.permute.xlu0 %626 }
  0xfb   :  { %v2063_v38 = vadd.f32 %v630_v36, %v576_v33  ;;  %v2065_v39 = vadd.f32 %v627_v37, %v573_v31  ;;  %v723_v33 = vsub.s32 0, %v2083_v60  ;;  %v739_v36 = vsub.s32 4, %v2083_v60 }
  0xfc   :  { %v735_v37 = vsub.s32 3, %v2083_v60 }
  0xfd   :  { %665 = vperm.xlu1 %1678, %v2063_v38   ;;  %662 = vperm.xlu0 %1677, %v2065_v39  }
  0xfe   :  { %v633_v40 = vpop.permute.xlu1 %632  ;;  %v639_v42 = vpop.permute.xlu0 %638 }
  0xff   :  { %v2069_v41 = vadd.f32 %v633_v40, %v579_v30  ;;  %v2072_v44 = vadd.f32 %v639_v42, %v585_v35  ;;  %v731_v35 = vsub.s32 2, %v2083_v60 }
 0x101   :  { %668 = vperm.xlu1 %1678, %v2069_v41  }
 0x102   :  { %v636_v43 = vpop.permute.xlu1 %635 }
 0x103   :  { %v2074_v45 = vadd.f32 %v636_v43, %v582_v32 }
 0x105   :  { %671 = vperm.xlu0 %1677, %v2074_v45   ;;  %674 = vperm.xlu1 %1678, %v2072_v44  }
 0x106   :  { %v642_v46 = vpop.permute.xlu1 %641 }
 0x107   :  { %v2078_v47 = vadd.f32 %v642_v46, %v588_v34  ;;  %v727_v34 = vsub.s32 1, %v2083_v60 }
 0x109   :  { %677 = vperm.xlu0 %1677, %v2078_v47  }
 0x133   :  { %v198_v50 = vpop.f32.mrb[0].mxu0  ;;  %v271_v51 = vpop.f32.mrb[0].mxu1 }
 0x134   :  { %v199_v52 = vadd.f32 %v1535_v48, %v198_v50  ;;  %v272_v53 = vadd.f32 %v1536_v49, %v271_v51  ;;  %v1597_v54 = vpop.f32.mrb[1].mxu1  ;;  %v1592_v55 = vpop.f32.mrb[1].mxu0  ;;  %v743_v51 = vsub.s32 5, %v2083_v60 }
 0x136   :  { %v279_v56 = vsel %vm275_vm2, %v272_v53, -inf  ;;  %v276_v57 = vsel %vm275_vm2, %v199_v52, -inf }
 0x137   :  { %280 = vmax.xlane.f32.xlu0 %v279_v56  ;;  %277 = vmax.xlane.f32.xlu1 %v276_v57 }
 0x17c   :  { %v666_v61 = vpop.permute.xlu1 %665  ;;  %v663_v63 = vpop.permute.xlu0 %662 }
 0x17d   :  { %v688_v2 = vrot.slane %v666_v61, %v2086_v62  ;;  %v684_v4 = vrot.slane %v663_v63, %v2086_v62 }
 0x17f   :  { %v706_v11 = vsel %vm705_vm3, %v688_v2, %v684_v4  ;;  %v1869_v4 = vmov 0.0|0.0  }
 0x180   :  { %v669_v1 = vpop.permute.xlu1 %668  ;;  %1650 = vmatprep.subr.bf16.mxu0 %v1869_v4  ;;  %1656 = vmatprep.subr.bf16.mxu1 %v1869_v4 }
 0x181   :  { %v692_v6 = vrot.slane %v669_v1, %v2086_v62 }
 0x183   :  { %v708_v15 = vsel %vm707_vm4, %v692_v6, %v706_v11 }
 0x184   :  { %v675_v7 = vpop.permute.xlu1 %674  ;;  %v672_v8 = vpop.permute.xlu0 %671 }
 0x185   :  { %v696_v12 = vrot.slane %v672_v8, %v2086_v62  ;;  %v700_v16 = vrot.slane %v675_v7, %v2086_v62 }
 0x187   :  { %v710_v17 = vsel %vm709_vm5, %v696_v12, %v708_v15 }
 0x188   :  { %v678_v18 = vpop.permute.xlu0 %677  ;;  %v712_v20 = vsel %vm711_vm6, %v700_v16, %v710_v17 }
 0x189   :  { %v704_v19 = vrot.slane %v678_v18, %v2086_v62  ;;  %v451_v18 = vld [vmem:[#allocation9] sm:$0xff] }
 0x18b   :  { %v714_v21 = vsel %vm713_vm7, %v704_v19, %v712_v20  ;;  %v452_v19 = vld [vmem:[#allocation9 + $0x8] sm:$0xff] }
 0x18c   :  { %v717_v22 = vsel %vm716_vm8, %v714_v21, -inf }
 0x18d   :  { %718 = vmax.xlane.f32.xlu0 %v717_v22 }
 0x1c4   :  { %v281_v23 = vpop.xlane.xlu0 %280  ;;  %v278_v24 = vpop.xlane.xlu1 %277 }
 0x1c5   :  { %v283_v25 = vsub.f32 %v272_v53, %v281_v23  ;;  %v282_v26 = vsub.f32 %v199_v52, %v278_v24  ;;  %v1651_v23 = vpack.c.bf16 %v452_v19, %v451_v18 }
 0x1c7   :  { %v286_v27 = vmul.f32 1.442695, %v283_v25  ;;  %v284_v28 = vmul.f32 1.442695, %v282_v26 }
 0x1c9   :  { %1679 = vpow2.f32 %v286_v27 }
 0x1ca   :  { %1681 = vpow2.f32 %v284_v28 }
 0x1d3   :  { %v2100_v29 = vpop.eup %1679 }
 0x1d4   :  { %v2102_v30 = vpop.eup %1681  ;;  %v291_v31 = vsel %vm275_vm2, %v2100_v29, 0.0 }
 0x1d5   :  { %292 = vadd.xlane.f32.xlu1 %v291_v31  ;;  %v288_v32 = vsel %vm275_vm2, %v2102_v30, 0.0 }
 0x1d6   :  { %289 = vadd.xlane.f32.xlu0 %v288_v32 }
 0x21a   :  { %v719_v40 = vpop.xlane.xlu0 %718 }
 0x21b   :  { %v724_v42 = vrot.slane %v719_v40, %v723_v33  ;;  %v728_v43 = vrot.slane %v719_v40, %v727_v34  ;;  %v732_v46 = vrot.slane %v719_v40, %v731_v35  ;;  %v740_v48 = vrot.slane %v719_v40, %v739_v36 }
 0x21c   :  { %v736_v52 = vrot.slane %v719_v40, %v735_v37  ;;  %v744_v58 = vrot.slane %v719_v40, %v743_v51 }
 0x21d   :  { %v751_v49 = vsub.f32 %v2065_v39, %v724_v42  ;;  %v752_v50 = vsub.f32 %v2063_v38, %v728_v43  ;;  %v753_v53 = vsub.f32 %v2069_v41, %v732_v46  ;;  %v755_v54 = vsub.f32 %v2072_v44, %v740_v48 }
 0x21e   :  { %v754_v39 = vsub.f32 %v2074_v45, %v736_v52  ;;  %v756_v59 = vsub.f32 %v2078_v47, %v744_v58 }
 0x21f   :  { %v757_v55 = vmul.f32 1.442695, %v751_v49  ;;  %v759_v56 = vmul.f32 1.442695, %v752_v50  ;;  %v765_v57 = vmul.f32 1.442695, %v755_v54 }
 0x220   :  { %v761_v38 = vmul.f32 1.442695, %v753_v53  ;;  %v763_v61 = vmul.f32 1.442695, %v754_v39  ;;  %v767_v41 = vmul.f32 1.442695, %v756_v59 }
 0x221   :  { %1683 = vpow2.f32 %v757_v55  ;;  %v453_v55 = vld [vmem:[#allocation9 + $0x10] sm:$0xff] }
 0x222   :  { %1685 = vpow2.f32 %v759_v56  ;;  %v454_v56 = vld [vmem:[#allocation9 + $0x18] sm:$0xff] }
 0x223   :  { %1687 = vpow2.f32 %v765_v57  ;;  %v1654_v57 = vpack.c.bf16 %v454_v56, %v453_v55 }
 0x224   :  { %1689 = vpow2.f32 %v761_v38 }
 0x225   :  { %1691 = vpow2.f32 %v763_v61 }
 0x226   :  { %1693 = vpow2.f32 %v767_v41 }
 0x22b   :  { %v2132_v63 = vpop.eup %1683 }
 0x22c   :  { %v2134_v44 = vpop.eup %1685  ;;  %776 = vperm.xlu0 %1677, %v2132_v63  }
 0x22d   :  { %779 = vperm.xlu1 %1678, %v2134_v44   ;;  %v2138_v1 = vpop.eup %1687 }
 0x22e   :  { %v2140_v45 = vpop.eup %1689 }
 0x22f   :  { %v2144_v47 = vpop.eup %1691 }
 0x230   :  { %788 = vperm.xlu0 %1677, %v2138_v1   ;;  %v2147_v2 = vpop.eup %1693 }
 0x231   :  { %782 = vperm.xlu1 %1678, %v2140_v45  }
 0x235   :  { %785 = vperm.xlu1 %1678, %v2144_v47  }
 0x239   :  { %791 = vperm.xlu1 %1678, %v2147_v2  }
 0x262   :  { %v293_v6 = vpop.xlane.xlu1 %292 }
 0x263   :  { %v290_v7 = vpop.xlane.xlu0 %289  ;;  %1695 = vrcp.f32 %v293_v6 }
 0x264   :  { %1697 = vrcp.f32 %v290_v7 }
 0x26d   :  { %v1696_v8 = vpop.eup %1695 }
 0x26e   :  { %v1698_v11 = vpop.eup %1697  ;;  %v297_v12 = vmul.f32 %v1696_v8, %v293_v6 }
 0x26f   :  { %v296_v15 = vmul.f32 %v1698_v11, %v290_v7 }
 0x270   :  { %v299_v16 = vsub.f32 2.0, %v297_v12 }
 0x271   :  { %v298_v17 = vsub.f32 2.0, %v296_v15 }
 0x272   :  { %v301_v20 = vmul.f32 %v1696_v8, %v299_v16 }
 0x273   :  { %v300_v21 = vmul.f32 %v1698_v11, %v298_v17 }
 0x274   :  { %v303_v22 = vmul.f32 %v2100_v29, %v301_v20 }
 0x275   :  { %v302_v24 = vmul.f32 %v2102_v30, %v300_v21  ;;  %v946_v21 = vld [vmem:[#allocation11 + $0x8] sm:$0xff] }
 0x276   :  { %1606 = vmatmul.mubr.msk.f32.vlgmr.msra.gmra.mrb[2].mxu1 %vm304_vm9, %v303_v22 }
 0x277   :  { %1601 = vmatmul.mubr.msk.f32.vlgmr.msra.gmra.mrb[2].mxu0 %vm304_vm9, %v302_v24  ;;  %1627 = vmatprep.mubr.msk.f32.mxu1 %vm1867_vm0, %v1866_v0 }
 0x278   :  { %1652 = vmatpush3.bf16.msra.mxu0 %v1651_v23  ;;  %1616 = vmatprep.mubr.msk.f32.mxu0 %vm1867_vm0, %v1866_v0  ;;  %v948_v23 = vld [vmem:[#allocation11 + $0x18] sm:$0xff] }
 0x279   :  { %1653 = vmatprep.subr.bf16.mxu0 %v1869_v4 }
 0x27c   :  { %1655 = vmatpush3.bf16.msra.mxu0 %v1654_v57 }
 0x27d   :  { %1630 = vmatprep.subr.mxu0 %v1866_v0 }
 0x2ab   :  { %v777_v26 = vpop.permute.xlu0 %776 }
 0x2ac   :  { %v780_v25 = vpop.permute.xlu1 %779  ;;  %v796_v28 = vrot.slane %v777_v26, %v2086_v62 }
 0x2ad   :  { %v800_v29 = vrot.slane %v780_v25, %v2086_v62 }
 0x2af   :  { %v817_v32 = vsel %vm705_vm3, %v800_v29, %v796_v28  ;;  %v789_v40 = vpop.permute.xlu0 %788 }
 0x2b0   :  { %v783_v27 = vpop.permute.xlu1 %782  ;;  %v812_v48 = vrot.slane %v789_v40, %v2086_v62 }
 0x2b1   :  { %v804_v30 = vrot.slane %v783_v27, %v2086_v62 }
 0x2b3   :  { %v818_v43 = vsel %vm707_vm4, %v804_v30, %v817_v32 }
 0x2b4   :  { %v786_v31 = vpop.permute.xlu1 %785 }
 0x2b5   :  { %v808_v42 = vrot.slane %v786_v31, %v2086_v62 }
 0x2b7   :  { %v819_v46 = vsel %vm709_vm5, %v808_v42, %v818_v43 }
 0x2b8   :  { %v792_v49 = vpop.permute.xlu1 %791  ;;  %v820_v52 = vsel %vm711_vm6, %v812_v48, %v819_v46 }
 0x2b9   :  { %v816_v50 = vrot.slane %v792_v49, %v2086_v62 }
 0x2bb   :  { %v821_v53 = vsel %vm713_vm7, %v816_v50, %v820_v52 }
 0x2bc   :  { %v823_v54 = vsel %vm716_vm8, %v821_v53, 0.0 }
 0x2bd   :  { %824 = vadd.xlane.f32.xlu0 %v823_v54 }
 0x349   :  { %v447_v58 = vpop.f32.mrb[2].mxu1 }
 0x34a   :  { %v825_v39 = vpop.xlane.xlu0 %824  ;;  %v374_v38 = vpop.f32.mrb[2].mxu0 }
 0x34b   :  { %1699 = vrcp.f32 %v825_v39  ;;  %v464_v59 = vcombine.low %v374_v38, %v447_v58  ;;  %v1602_v61 = vpop.f32.mrb[3].mxu0  ;;  %v1607_v41 = vpop.f32.mrb[3].mxu1 }
 0x34d   :  { %1617 = vmatmul.mubr.msk.f32.vlgmr.msra.gmra.mrb[4].mxu0 %vm125_vm1, %v464_v59 }
 0x34e   :  { %1632 = vmatprep.mubr.msk.f32.mxu0 %vm1867_vm0, %v1866_v0 }
 0x355   :  { %v1700_v6 = vpop.eup %1699 }
 0x356   :  { %v827_v7 = vmul.f32 %v1700_v6, %v825_v39 }
 0x358   :  { %v828_v8 = vsub.f32 2.0, %v827_v7 }
 0x35a   :  { %v829_v11 = vmul.f32 %v1700_v6, %v828_v8 }
 0x35c   :  { %v834_v12 = vrot.slane %v829_v11, %v723_v33  ;;  %v838_v16 = vrot.slane %v829_v11, %v727_v34  ;;  %v842_v18 = vrot.slane %v829_v11, %v731_v35  ;;  %v846_v20 = vrot.slane %v829_v11, %v735_v37  ;;  %v947_v37 = vld [vmem:[#allocation11 + $0x10] sm:$0xff] }
 0x35e   :  { %v861_v15 = vmul.f32 %v2132_v63, %v834_v12  ;;  %v862_v17 = vmul.f32 %v2134_v44, %v838_v16  ;;  %v863_v19 = vmul.f32 %v2140_v45, %v842_v18  ;;  %v864_v33 = vmul.f32 %v2144_v47, %v846_v20  ;;  %v945_v45 = vld [vmem:[#allocation11] sm:$0xff] }
 0x35f   :  { %v850_v63 = vrot.slane %v829_v11, %v739_v36  ;;  %v854_v44 = vrot.slane %v829_v11, %v743_v51  ;;  %v1657_v22 = vpack.c.bf16 %v946_v21, %v945_v45  ;;  %v1660_v47 = vpack.c.bf16 %v948_v23, %v947_v37  ;;  %v1543_v23 = vld [vmem:[%s2271_s7] ss:$0 sm:$0xff] }
 0x360   :  { %869 = vperm.xlu1 %1678, %v861_v15  }
 0x361   :  { %v865_v34 = vmul.f32 %v2138_v1, %v850_v63  ;;  %v866_v35 = vmul.f32 %v2147_v2, %v854_v44  ;;  %1658 = vmatpush3.bf16.msra.mxu1 %v1657_v22 }
 0x362   :  { %1659 = vmatprep.subr.bf16.mxu1 %v1869_v4 }
 0x364   :  { %874 = vperm.xlu1 %1678, %v862_v17  }
 0x365   :  { %1661 = vmatpush3.bf16.msra.mxu1 %v1660_v47 }
 0x366   :  { %1635 = vmatprep.subr.mxu1 %v1866_v0 }
 0x368   :  { %879 = vperm.xlu1 %1678, %v863_v19  }
 0x36c   :  { %884 = vperm.xlu1 %1678, %v864_v33  }
 0x370   :  { %889 = vperm.xlu1 %1678, %v865_v34  }
 0x374   :  { %894 = vperm.xlu1 %1678, %v866_v35  }
 0x3df   :  { %v870_v36 = vpop.permute.xlu1 %869 }
 0x3e0   :  { %v897_v1 = vmul.f32 %v870_v36, %v2012_v5 }
 0x3e2   :  { %v903_v2 = vsel %vm125_vm1, %v897_v1, 0.0 }
 0x3e3   :  { %v875_v51 = vpop.permute.xlu1 %874  ;;  %v904_v29 = vrot.slane %v903_v2, 4 }
 0x3e4   :  { %v898_v24 = vmul.f32 %v875_v51, %v2021_v10 }
 0x3e5   :  { %v905_v5 = vadd.f32 %v904_v29, %v903_v2 }
 0x3e6   :  { %v910_v25 = vsel %vm125_vm1, %v898_v24, 0.0 }
 0x3e7   :  { %v911_v26 = vrot.slane %v910_v25, 4  ;;  %v880_v27 = vpop.permute.xlu1 %879  ;;  %v906_v52 = vrot.slane %v905_v5, 2 }
 0x3e8   :  { %v899_v28 = vmul.f32 %v880_v27, %v2005_v3 }
 0x3e9   :  { %v912_v30 = vadd.f32 %v911_v26, %v910_v25  ;;  %v907_v39 = vadd.f32 %v906_v52, %v905_v5 }
 0x3ea   :  { %v917_v4 = vsel %vm125_vm1, %v899_v28, 0.0 }
 0x3eb   :  { %v918_v31 = vrot.slane %v917_v4, 4  ;;  %v885_v32 = vpop.permute.xlu1 %884  ;;  %v913_v43 = vrot.slane %v912_v30, 2  ;;  %v908_v8 = vrot.slane %v907_v39, 1 }
 0x3ec   :  { %v900_v40 = vmul.f32 %v885_v32, %v2019_v9 }
 0x3ed   :  { %v919_v42 = vadd.f32 %v918_v31, %v917_v4  ;;  %v914_v54 = vadd.f32 %v913_v43, %v912_v30  ;;  %v909_v20 = vadd.f32 %v908_v8, %v907_v39  ;;  %v1552_v30 = vld [vmem:[%s2273_s9] ss:$0 sm:$0xff]  ;;  %s1871_s9 = smov [#allocation12]  }
 0x3ee   :  { %v924_v10 = vsel %vm125_vm1, %v900_v40, 0.0  ;;  %s1524_s26 = sshll.u32 %s1871_s9, 4  ;;  %s1525_s26 = int_to_ptr.vmem [resolvable:$true] %s1524_s26 }
 0x3ef   :  { %v925_v46 = vrot.slane %v924_v10, 4  ;;  %v890_v48 = vpop.permute.xlu1 %889  ;;  %v920_v49 = vrot.slane %v919_v42, 2  ;;  %v915_v41 = vrot.slane %v914_v54, 1  ;;  %s1827_s27 = scalar_lea.vmem %s1525_s26, 32  ;;  %p1832_p13 = scmp.lt.s32.totalorder %s1525_s26, %s1525_s26 }
 0x3f0   :  { %v901_v50 = vmul.f32 %v890_v48, %v2029_v14  ;;  %p1828_p12 = scmp.ne.s32.totalorder %s1525_s26, %s1827_s27  ;;  %p1833_p0 = scmp.lt.s32.totalorder %s1827_s27, %s1827_s27 }
 0x3f1   :  { %v926_v3 = vadd.f32 %v925_v46, %v924_v10  ;;  %v921_v58 = vadd.f32 %v920_v49, %v919_v42  ;;  %v916_v16 = vadd.f32 %v915_v41, %v914_v54  ;;  %v1870_v46 = vmov 1966171168  }
 0x3f2   :  { %v931_v53 = vsel %vm125_vm1, %v901_v50, 0.0  ;;  %v1050_v48 = vunpack.c.l.s4 %v1870_v46  ;;  %p1834_p1 = por %p1833_p0, %p1832_p13 }
 0x3f3   :  { %v927_v55 = vrot.slane %v926_v3, 2  ;;  %v932_v56 = vrot.slane %v931_v53, 4  ;;  %v895_v57 = vpop.permute.xlu1 %894  ;;  %v922_v14 = vrot.slane %v921_v58, 1  ;;  %v962_v34 = vsel %vm705_vm3, %v916_v16, %v909_v20 }
 0x3f4   :  { %v902_v9 = vmul.f32 %v895_v57, %v2027_v13  ;;  %v1051_v49 = vunpack.c.0.s8 %v1050_v48  ;;  %p1835_p2 = pnand %p1834_p1, %p1828_p12 }
 0x3f5   :  { %v928_v38 = vadd.f32 %v927_v55, %v926_v3  ;;  %v933_v59 = vadd.f32 %v932_v56, %v931_v53  ;;  %v923_v19 = vadd.f32 %v922_v14, %v921_v58 }
 0x3f6   :  { %v938_v61 = vsel %vm125_vm1, %v902_v9, 0.0  ;;  %v1054_v50 = vsub.s32 %v1051_v49, %v2083_v60 }
 0x3f7   :  { %v934_v6 = vrot.slane %v933_v59, 2  ;;  %v939_v7 = vrot.slane %v938_v61, 4  ;;  %v929_v11 = vrot.slane %v928_v38, 1  ;;  %v963_v35 = vsel %vm707_vm4, %v923_v19, %v962_v34 }
 0x3f9   :  { %v935_v12 = vadd.f32 %v934_v6, %v933_v59  ;;  %v940_v15 = vadd.f32 %v939_v7, %v938_v61  ;;  %v930_v33 = vadd.f32 %v929_v11, %v928_v38 }
 0x3fb   :  { %v936_v17 = vrot.slane %v935_v12, 1  ;;  %v941_v18 = vrot.slane %v940_v15, 2  ;;  %v964_v21 = vsel %vm709_vm5, %v930_v33, %v963_v35 }
 0x3fd   :  { %v942_v13 = vadd.f32 %v941_v18, %v940_v15  ;;  %v937_v63 = vadd.f32 %v936_v17, %v935_v12 }
 0x3ff   :  { %v943_v44 = vrot.slane %v942_v13, 1  ;;  %v965_v22 = vsel %vm711_vm6, %v937_v63, %v964_v21 }
 0x401   :  { %v944_v45 = vadd.f32 %v943_v44, %v942_v13 }
 0x403   :  { %v966_v37 = vsel %vm713_vm7, %v944_v45, %v965_v22 }
 0x404   :  { %1628 = vmatmul.mubr.msk.f32.vlgmr.msra.gmra.mrb[4].mxu1 %vm125_vm1, %v966_v37  ;;  %vm1516_vm1 = vcmask 17408  }
 0x405   :  { %1637 = vmatprep.mubr.msk.f32.mxu1 %vm1867_vm0, %v1866_v0 }
 0x420   :  { %v533_v47 = vpop.f32.mrb[4].mxu0 }
 0x421   :  { %v534_v36 = vadd.f32 %v1543_v23, %v533_v47  ;;  %v1618_v1 = vpop.f32.mrb[5].mxu0 }
 0x423   :  { %v537_v51 = vmul.f32 %v534_v36, %v534_v36 }
 0x425   :  { %v539_v24 = vsel %vm538_vm10, %v537_v51, 0.0 }
 0x426   :  { %540 = vadd.xlane.f32.xlu0 %v539_v24 }
 0x4b3   :  { %v541_v2 = vpop.xlane.xlu0 %540 }
 0x4b4   :  { %v542_v25 = vmax.f32 %v541_v2, 1e-24 }
 0x4b6   :  { %1701 = vrsqrt.f32 %v542_v25 }
 0x4c0   :  { %v1702_v26 = vpop.eup %1701 }
 0x4c1   :  { %v544_v27 = vmul.f32 %v1702_v26, %v534_v36 }
 0x4c3   :  { %v546_v28 = vcombine.high %v544_v27, %v544_v27  ;;  %549 = vst.msk [vmem:[#allocation2] sm:$0xf] %vm548_vm11, %v544_v27 }
 0x4c5   :  { %550 = vst.msk [vmem:[#allocation2 + $0x4] sm:$0xf] %vm548_vm11, %v546_v28 }
 0x4ca   :  { %v1095_v29 = vld [vmem:[#allocation2] sm:$0xf] }
 0x4cb   :  { %1631 = vmatpush3.xpose.msk.msra.mxu0 %vm538_vm10, %v1095_v29 }
 0x4cc   :  { %v1096_v4 = vld [vmem:[#allocation2 + $0x4] sm:$0xf]  ;;  %1640 = vmatprep.subr.mxu0 %v1866_v0 }
 0x4cd   :  { %1636 = vmatpush3.xpose.msk.msra.mxu1 %vm538_vm10, %v1096_v4 }
 0x4ce   :  { %1645 = vmatprep.subr.mxu1 %v1866_v0 }
 0x4d7   :  { %v1035_v31 = vpop.f32.mrb[4].mxu1 }
 0x4d8   :  { %v1036_v32 = vadd.f32 %v1552_v30, %v1035_v31  ;;  %v1629_v40 = vpop.f32.mrb[5].mxu1 }
 0x4da   :  { %v1039_v5 = vmul.f32 %v1036_v32, %v1036_v32 }
 0x4dc   :  { %v1041_v42 = vsel %vm1040_vm12, %v1039_v5, 0.0 }
 0x4dd   :  { %1042 = vadd.xlane.f32.xlu1 %v1041_v42 }
 0x56a   :  { %v1043_v10 = vpop.xlane.xlu1 %1042 }
 0x56b   :  { %v1044_v43 = vmax.f32 %v1043_v10, 1e-24 }
 0x56d   :  { %1703 = vrsqrt.f32 %v1044_v43 }
 0x577   :  { %v1704_v52 = vpop.eup %1703 }
 0x578   :  { %v1046_v3 = vmul.f32 %v1704_v52, %v1036_v32 }
 0x57a   :  { %v1048_v53 = vcombine.high %v1046_v3, %v1046_v3  ;;  %v1055_v54 = vrot.slane %v1046_v3, %v1054_v50 }
 0x57c   :  { %v1062_v55 = vrot.slane %v1048_v53, %v1054_v50  ;;  %v1063_v56 = vcombine.high %v1055_v54, %v1055_v54  ;;  %v1071_v57 = vrot.slane %v1055_v54, %v1054_v50 }
 0x57e   :  { %v1064_v58 = vcombine.high %v1062_v55, %v1062_v55  ;;  %v1085_v9 = vrot.slane %v1063_v56, %v1054_v50  ;;  %v1093_v39 = vcombine.high %v1071_v57, %v1071_v57  ;;  %v1078_v38 = vrot.slane %v1062_v55, %v1054_v50 }
 0x580   :  { %v1094_v59 = vcombine.high %v1085_v9, %v1085_v9  ;;  %v1097_v61 = vcombine.low %v1071_v57, %v1085_v9  ;;  %v1092_v41 = vrot.slane %v1064_v58, %v1054_v50  ;;  %v1111_v7 = vrot.slane %v1093_v39, %v1054_v50 }
 0x582   :  { %v1104_v6 = vrot.slane %v1097_v61, %v1054_v50  ;;  %v1196_v14 = vcombine.low %v1094_v59, %v1078_v38  ;;  %v1210_v60 = vrot.slane %v1092_v41, %v1054_v50 }
 0x584   :  { %v1112_v8 = vcombine.low %v1104_v6, %v1111_v7  ;;  %v1203_v11 = vrot.slane %v1196_v14, %v1054_v50 }
 0x586   :  { %v2227_v12 = vrot.slane %v1112_v8, %v1054_v50  ;;  %v1211_v15 = vcombine.low %v1203_v11, %v1210_v60 }
 0x588   :  { %1633 = vmatmul.mubr.msk.f32.vlgmr.msra.gmra.mrb[6].mxu0 %vm538_vm10, %v2227_v12  ;;  %v2231_v16 = vrot.slane %v1211_v15, %v1054_v50 }
 0x589   :  { %1641 = vmatpush3.msk.msra.mxu0 %vm1327_vm13, %v1095_v29  ;;  %1642 = vmatprep.mubr.msk.f32.mxu0 %vm1867_vm0, %v1866_v0 }
 0x58a   :  { %1638 = vmatmul.mubr.msk.f32.vlgmr.msra.gmra.mrb[6].mxu1 %vm538_vm10, %v2231_v16 }
 0x58b   :  { %1646 = vmatpush3.msk.msra.mxu1 %vm1327_vm13, %v1096_v4  ;;  %1647 = vmatprep.mubr.msk.f32.mxu1 %vm1867_vm0, %v1866_v0  ;;  %vm1477_vm0 = vcmask 518144  }
 0x65b   :  { %v1192_v17 = vpop.f32.mrb[6].mxu0 }
 0x65c   :  { %v1634_v18 = vpop.f32.mrb[7].mxu0  ;;  %v1295_v19 = vsel %vm1294_vm14, %v1192_v17, -inf }
 0x65d   :  { %v1290_v20 = vpop.f32.mrb[6].mxu1  ;;  %1296 = vmax.xlane.f32.xlu0 %v1295_v19 }
 0x65e   :  { %v1639_v33 = vpop.f32.mrb[7].mxu1  ;;  %v1298_v13 = vsel %vm1294_vm14, %v1290_v20, -inf }
 0x661   :  { %1299 = vmax.xlane.f32.xlu0 %v1298_v13 }
 0x6ea   :  { %v1297_v63 = vpop.xlane.xlu0 %1296 }
 0x6eb   :  { %v1301_v34 = vsub.f32 %v1192_v17, %v1297_v63 }
 0x6ed   :  { %v1303_v44 = vmul.f32 1.442695, %v1301_v34 }
 0x6ee   :  { %v1300_v35 = vpop.xlane.xlu0 %1299 }
 0x6ef   :  { %1705 = vpow2.f32 %v1303_v44  ;;  %v1302_v45 = vsub.f32 %v1290_v20, %v1300_v35 }
 0x6f1   :  { %v1305_v21 = vmul.f32 1.442695, %v1302_v45 }
 0x6f3   :  { %1707 = vpow2.f32 %v1305_v21 }
 0x6f9   :  { %v1706_v0 = vpop.eup %1705 }
 0x6fa   :  { %v1307_v22 = vsel %vm1294_vm14, %v1706_v0, 0.0 }
 0x6fb   :  { %1308 = vadd.xlane.f32.xlu0 %v1307_v22 }
 0x6fd   :  { %v1708_v37 = vpop.eup %1707 }
 0x6fe   :  { %v1310_v23 = vsel %vm1294_vm14, %v1708_v37, 0.0 }
 0x6ff   :  { %1311 = vadd.xlane.f32.xlu0 %v1310_v23 }
 0x788   :  { %v1309_v47 = vpop.xlane.xlu0 %1308 }
 0x789   :  { %1709 = vrcp.f32 %v1309_v47 }
 0x78c   :  { %v1312_v36 = vpop.xlane.xlu0 %1311 }
 0x78d   :  { %1711 = vrcp.f32 %v1312_v36 }
 0x793   :  { %v1710_v1 = vpop.eup %1709 }
 0x794   :  { %v1315_v51 = vmul.f32 %v1710_v1, %v1309_v47 }
 0x796   :  { %v1317_v24 = vsub.f32 2.0, %v1315_v51 }
 0x797   :  { %v1712_v2 = vpop.eup %1711 }
 0x798   :  { %v1319_v25 = vmul.f32 %v1710_v1, %v1317_v24  ;;  %v1316_v26 = vmul.f32 %v1712_v2, %v1312_v36 }
 0x79a   :  { %v1321_v27 = vmul.f32 %v1706_v0, %v1319_v25  ;;  %v1318_v28 = vsub.f32 2.0, %v1316_v26 }
 0x79c   :  { %v1320_v29 = vmul.f32 %v1712_v2, %v1318_v28  ;;  %1643 = vmatmul.mubr.msk.f32.vlgmr.msra.gmra.mrb[8].mxu0 %vm1323_vm15, %v1321_v27 }
 0x79e   :  { %v1322_v4 = vmul.f32 %v1708_v37, %v1320_v29 }
 0x7a0   :  { %1648 = vmatmul.mubr.msk.f32.vlgmr.msra.gmra.mrb[8].mxu1 %vm1323_vm15, %v1322_v4 }
 0x86f   :  { %v1396_v30 = vpop.f32.mrb[8].mxu0 }
 0x870   :  { %v1475_v31 = vmul.f32 %v1396_v30, %v1396_v30  ;;  %v1644_v32 = vpop.f32.mrb[9].mxu0 }
 0x872   :  { %v1478_v40 = vsel %vm1477_vm0, %v1475_v31, 0.0 }
 0x873   :  { %v1471_v5 = vpop.f32.mrb[8].mxu1  ;;  %1479 = vadd.xlane.f32.xlu0 %v1478_v40 }
 0x874   :  { %v1476_v42 = vmul.f32 %v1471_v5, %v1471_v5  ;;  %v1649_v10 = vpop.f32.mrb[9].mxu1 }
 0x876   :  { %v1481_v43 = vsel %vm1477_vm0, %v1476_v42, 0.0 }
 0x877   :  { %1482 = vadd.xlane.f32.xlu0 %v1481_v43 }
 0x900   :  { %v1480_v46 = vpop.xlane.xlu0 %1479 }
 0x901   :  { %v1484_v48 = vmax.f32 %v1480_v46, 1e-24 }
 0x903   :  { %1713 = vrsqrt.f32 %v1484_v48 }
 0x904   :  { %v1483_v49 = vpop.xlane.xlu0 %1482 }
 0x905   :  { %v1485_v50 = vmax.f32 %v1483_v49, 1e-24 }
 0x907   :  { %1715 = vrsqrt.f32 %v1485_v50 }
 0x90d   :  { %v1714_v52 = vpop.eup %1713 }
 0x90e   :  { %v1488_v3 = vmul.f32 %v1714_v52, %v1396_v30 }
 0x910   :  { %v1492_v53 = vmul.f32 %v1488_v3, %v2227_v12 }
 0x911   :  { %v1716_v54 = vpop.eup %1715 }
 0x912   :  { %v1494_v55 = vsel %vm1477_vm0, %v1492_v53, 0.0  ;;  %v1489_v56 = vmul.f32 %v1716_v54, %v1471_v5 }
 0x913   :  { %1495 = vadd.xlane.f32.xlu0 %v1494_v55 }
 0x914   :  { %v1493_v57 = vmul.f32 %v1489_v56, %v2231_v16 }
 0x916   :  { %v1497_v58 = vsel %vm1477_vm0, %v1493_v57, 0.0 }
 0x917   :  { %1498 = vadd.xlane.f32.xlu0 %v1497_v58 }
 0x9a0   :  { %v1496_v9 = vpop.xlane.xlu0 %1495 }
 0x9a1   :  { %v1500_v39 = vadd.f32 1.0, %v1496_v9 }
 0x9a3   :  { %v1502_v59 = vmul.f32 0.5, %v1500_v39 }
 0x9a4   :  { %v1499_v38 = vpop.xlane.xlu0 %1498 }
 0x9a5   :  { %v1501_v61 = vadd.f32 1.0, %v1499_v38  ;;  %v1509_v6 = vrot.slane %v1502_v59, %v2086_v62 }
 0x9a7   :  { %v1503_v41 = vmul.f32 0.5, %v1501_v61 }
 0x9a9   :  { %v1513_v7 = vrot.slane %v1503_v41, %v2086_v62 }
 0x9ab   :  { %v1514_v14 = vsel %vm705_vm3, %v1513_v7, %v1509_v6 }
 0x9ac   :  { %1517 = vst.msk [vmem:[#allocation12] sm:$0x3] %vm1516_vm1, %v1514_v14 }
 0x9ad   :  { %1838 = shalt.err (!%p1835_p2)
}
 0x9ae   :  { %s1839_s6 = scalar_lea.hbm %s2274_s10, 32 }
 0x9af   :  { %p1840_p3 = scmp.ne.s32.totalorder %s2274_s10, %s1839_s6  ;;  %p1843_p4 = scmp.lt.u32.totalorder %s1839_s6, %s2274_s10 }
 0x9b1   :  { %p1845_p5 = pnand %p1843_p4, %p1840_p3 }
 0x9b3   :  { %1848 = shalt.err (!%p1845_p5)
}
 0x9b4   :  { %1527 = dma.vmem_to_hbm [thread:$0]  %s1525_s26, 32, %s2274_s10, [#allocation5]  }
 0x9b5   :  { %1855 = dma.done.wait [#allocation5], 32  }
 0x9b6   :  { %1856 = vsyncadd [#allocation5], 4294967264 }
 0x9b7   :  { %1531 = vsyncpa [#allocation4], 1 }
 0x9b8   :  { %1532 = vsyncpa [#allocation7], 1 }
 0x9b9   :  { %1533 = vsyncpa [#allocation10], 1 }
 0x9ba   :  { %1534 = vsyncpa [#allocation5], 1 }

</bundles_post_ra>
